<compile_context>
chip_gen: v5e
topology: v5e:2x2
jax: 0.10.0
libtpu: 0.0.40
codegen_flags: <defaults>
</compile_context>

<pallas_src>
import math
import functools

import jax
import jax.numpy as jnp
from jax.experimental import pallas as pl
from jax.experimental.pallas import tpu as pltpu

BF16 = jnp.bfloat16
F32 = jnp.float32
_VMEM_LIMIT = 64 * 1024 * 1024


def _seq_tile(n, pref=256):
    """Pick a sequence tile: `pref` if it divides n, else the full extent."""
    return pref if (n >= pref and n % pref == 0) else n


# ----------------------------------------------------------------------------
# Kernel 1: packed QKV projection  (x @ [Wq|Wk|Wv] + b)  -> q (bf16), kv (bf16)
# ----------------------------------------------------------------------------
def qkv_proj_kernel(x_ref, w_ref, b_ref, q_ref, kv_ref, *, d_model):
    x = x_ref[0].astype(BF16)                                        # (TS, D)
    y = jnp.dot(x, w_ref[...], preferred_element_type=F32) + b_ref[...]   # (TS, 3D) f32
    q_ref[0] = y[:, :d_model].astype(BF16)
    kv_ref[0] = y[:, d_model:].astype(BF16)


def qkv_proj(x, w_qkv, b_qkv):
    B, S, D = x.shape
    TS = _seq_tile(S)
    return pl.pallas_call(
        functools.partial(qkv_proj_kernel, d_model=D),
        out_shape=(jax.ShapeDtypeStruct((B, S, D), BF16),
                   jax.ShapeDtypeStruct((B, S, 2 * D), BF16)),
        grid=(B, S // TS),
        in_specs=[
            pl.BlockSpec((1, TS, D), lambda b, s: (b, s, 0)),
            pl.BlockSpec((D, 3 * D), lambda b, s: (0, 0)),
            pl.BlockSpec((1, 3 * D), lambda b, s: (0, 0)),
        ],
        out_specs=(pl.BlockSpec((1, TS, D), lambda b, s: (b, s, 0)),
                   pl.BlockSpec((1, TS, 2 * D), lambda b, s: (b, s, 0))),
        compiler_params=pltpu.CompilerParams(
            dimension_semantics=("parallel", "parallel"),
            vmem_limit_bytes=_VMEM_LIMIT),
    )(x, w_qkv, b_qkv)


# ----------------------------------------------------------------------------
# Kernel 2: rest of the TransformerEncoderLayer per (batch, query-tile):
#   attention (iota causal mask, per-head wo accumulation) + residual + LN1 +
#   FFN (ReLU) + residual + LN2.   Post-norm, matching nn.TransformerEncoderLayer.
# ----------------------------------------------------------------------------
def encoder_block_kernel(x_ref, q_ref, kv_ref,
                         wo_ref, bo_ref,
                         ln1_g_ref, ln1_b_ref,
                         w1_ref, b1_ref, w2_ref, b2_ref,
                         ln2_g_ref, ln2_b_ref,
                         o_ref, *, nhead, tq):
    x = x_ref[0]                       # (TQ, D) f32  residual stream rows
    q = q_ref[0]                       # (TQ, D) bf16
    kv = kv_ref[0]                     # (S, 2D) bf16
    TQ, D = x.shape
    S = kv.shape[0]
    hd = D // nhead
    scale = 1.0 / math.sqrt(hd)

    qi = pl.program_id(1)
    row = qi * tq + jax.lax.broadcasted_iota(jnp.int32, (TQ, S), 0)
    col = jax.lax.broadcasted_iota(jnp.int32, (TQ, S), 1)
    causal = col <= row                # in-kernel causal mask (no HBM traffic)

    wo = wo_ref[...]                   # (D, D) bf16, loaded once
    attn = jnp.zeros((TQ, D), F32)
    for h in range(nhead):             # static unroll; accumulate through wo slices
        qh = q[:, h * hd:(h + 1) * hd]
        kh = kv[:, h * hd:(h + 1) * hd]
        vh = kv[:, D + h * hd:D + (h + 1) * hd]
        s = jnp.dot(qh, kh.T, preferred_element_type=F32) * scale      # (TQ, S) f32
        s = jnp.where(causal, s, -jnp.inf)
        s = s - jnp.max(s, axis=-1, keepdims=True)
        p = jnp.exp(s)
        p = p * pl.reciprocal(jnp.sum(p, axis=-1, keepdims=True), approx=True)
        ctx = jnp.dot(p.astype(BF16), vh, preferred_element_type=F32)  # (TQ, hd)
        attn += jnp.dot(ctx.astype(BF16), wo[h * hd:(h + 1) * hd, :],
                        preferred_element_type=F32)                    # (TQ, D)
    attn = attn + bo_ref[...]

    # residual + LayerNorm1 (f32 stats); dropout is identity in eval mode
    y = x + attn
    mu = jnp.mean(y, axis=-1, keepdims=True)
    var = jnp.mean((y - mu) ** 2, axis=-1, keepdims=True)
    y = (y - mu) * jax.lax.rsqrt(var + 1e-5) * ln1_g_ref[...] + ln1_b_ref[...]

    # feed-forward (bf16 MXU, f32 accumulation)
    h1 = jnp.dot(y.astype(BF16), w1_ref[...], preferred_element_type=F32) + b1_ref[...]
    h1 = jnp.maximum(h1, 0.0)
    h2 = jnp.dot(h1.astype(BF16), w2_ref[...], preferred_element_type=F32) + b2_ref[...]

    # residual + LayerNorm2
    z = y + h2
    mu2 = jnp.mean(z, axis=-1, keepdims=True)
    var2 = jnp.mean((z - mu2) ** 2, axis=-1, keepdims=True)
    z = (z - mu2) * jax.lax.rsqrt(var2 + 1e-5) * ln2_g_ref[...] + ln2_b_ref[...]

    o_ref[0] = z


def encoder_layer(x, p, nhead):
    B, S, D = x.shape
    F = p["w1"].shape[1]
    TQ = _seq_tile(S)

    q, kv = qkv_proj(x, p["w_qkv"], p["b_qkv"])        # bf16 activations

    def const(shape):
        return pl.BlockSpec(shape, lambda b, qi: (0,) * len(shape))

    in_specs = [
        pl.BlockSpec((1, TQ, D), lambda b, qi: (b, qi, 0)),     # x residual rows
        pl.BlockSpec((1, TQ, D), lambda b, qi: (b, qi, 0)),     # q tile
        pl.BlockSpec((1, S, 2 * D), lambda b, qi: (b, 0, 0)),   # full-sequence K|V
        const((D, D)), const((1, D)),                           # wo, bo
        const((1, D)), const((1, D)),                           # ln1 gamma/beta
        const((D, F)), const((1, F)),                           # w1, b1
        const((F, D)), const((1, D)),                           # w2, b2
        const((1, D)), const((1, D)),                           # ln2 gamma/beta
    ]
    out_specs = pl.BlockSpec((1, TQ, D), lambda b, qi: (b, qi, 0))

    return pl.pallas_call(
        functools.partial(encoder_block_kernel, nhead=nhead, tq=TQ),
        out_shape=jax.ShapeDtypeStruct((B, S, D), F32),
        grid=(B, S // TQ),
        in_specs=in_specs,
        out_specs=out_specs,
        compiler_params=pltpu.CompilerParams(
            dimension_semantics=("parallel", "parallel"),
            vmem_limit_bytes=_VMEM_LIMIT),
    )(x, q, kv,
      p["wo"], p["bo"], p["ln1_g"], p["ln1_b"],
      p["w1"], p["b1"], p["w2"], p["b2"],
      p["ln2_g"], p["ln2_b"])


# ----------------------------------------------------------------------------
# Kernel 3: decoder (vocabulary projection), tiled over (rows, vocab)
# ----------------------------------------------------------------------------
def decoder_kernel(x_ref, w_ref, b_ref, o_ref):
    o_ref[...] = (jnp.dot(x_ref[...].astype(BF16), w_ref[...],
                          preferred_element_type=F32) + b_ref[...])


def decoder(x2d, w, b, *, tm=256, tn=512):
    N, D = x2d.shape
    V = w.shape[1]
    TM = tm if (N >= tm and N % tm == 0) else N
    TN = tn if (V >= tn and V % tn == 0) else V
    return pl.pallas_call(
        decoder_kernel,
        out_shape=jax.ShapeDtypeStruct((N, V), F32),
        grid=(N // TM, V // TN),
        in_specs=[
            pl.BlockSpec((TM, D), lambda i, j: (i, 0)),
            pl.BlockSpec((D, TN), lambda i, j: (0, j)),
            pl.BlockSpec((1, TN), lambda i, j: (0, j)),
        ],
        out_specs=pl.BlockSpec((TM, TN), lambda i, j: (i, j)),
        compiler_params=pltpu.CompilerParams(
            dimension_semantics=("parallel", "parallel"),
            vmem_limit_bytes=_VMEM_LIMIT),
    )(x2d, w, b)


# ----------------------------------------------------------------------------
# Parameters (deterministic) + positional encoding + full forward
# ----------------------------------------------------------------------------
def make_params(key, ntoken, ninp, nhead, nhid, nlayers):
    keys = iter(jax.random.split(key, 2 + nlayers * 6))
    u = lambda k, shape, r: jax.random.uniform(k, shape, F32, -r, r)

    params = {
        "emb": u(next(keys), (ntoken, ninp), 0.1),                   # nn.Embedding weight (f32)
        "dec_w": u(next(keys), (ninp, ntoken), 0.1).astype(BF16),    # decoder weight (in,out)
        "dec_b": jnp.zeros((1, ntoken), F32),
    }
    r = 1.0 / math.sqrt(ninp)
    layers = []
    for _ in range(nlayers):
        wq = u(next(keys), (ninp, ninp), r)
        wk = u(next(keys), (ninp, ninp), r)
        wv = u(next(keys), (ninp, ninp), r)
        layers.append({
            "w_qkv": jnp.concatenate([wq, wk, wv], axis=1).astype(BF16),   # packed (D, 3D)
            "b_qkv": jnp.zeros((1, 3 * ninp), F32),
            "wo": u(next(keys), (ninp, ninp), r).astype(BF16),
            "bo": jnp.zeros((1, ninp), F32),
            "ln1_g": jnp.ones((1, ninp), F32),
            "ln1_b": jnp.zeros((1, ninp), F32),
            "w1": u(next(keys), (ninp, nhid), r).astype(BF16),
            "b1": jnp.zeros((1, nhid), F32),
            "w2": u(next(keys), (nhid, ninp), 1.0 / math.sqrt(nhid)).astype(BF16),
            "b2": jnp.zeros((1, ninp), F32),
            "ln2_g": jnp.ones((1, ninp), F32),
            "ln2_b": jnp.zeros((1, ninp), F32),
        })
    params["layers"] = layers
    return params


def positional_encoding_table(max_len, d_model):
    position = jnp.arange(max_len, dtype=F32)[:, None]
    div_term = jnp.exp(jnp.arange(0, d_model, 2, dtype=F32)
                       * (-math.log(10000.0) / d_model))
    pe = jnp.zeros((max_len, d_model), F32)
    pe = pe.at[:, 0::2].set(jnp.sin(position * div_term))
    pe = pe.at[:, 1::2].set(jnp.cos(position * div_term))
    return pe                                   # (max_len, d_model)


def transformer_forward(src, params, *, ninp, nhead):
    # src: (S, B) int32 token ids  ->  output: (S, B, ntoken) f32
    S, B = src.shape
    emb = jnp.take(params["emb"], src, axis=0)          # (S, B, D) gather (plain JAX)
    pe = positional_encoding_table(S, ninp)             # (S, D)
    # embedding scale + positional encoding: fused by XLA into the gather epilogue
    x = jnp.transpose(emb, (1, 0, 2)) * math.sqrt(ninp) + pe[None, :, :]   # (B, S, D)
    # TODO(synk): dropout (p) is identity in eval mode; not implemented stochastically.

    for lp in params["layers"]:
        x = encoder_layer(x, lp, nhead)                 # Pallas kernels per layer

    x2d = x.reshape(B * S, ninp)
    logits = decoder(x2d, params["dec_w"], params["dec_b"])     # (B*S, V)
    return jnp.transpose(logits.reshape(B, S, -1), (1, 0, 2))   # (S, B, ntoken)


if __name__ == "__main__":
    # small config consistent with the module signature
    ntoken, ninp, nhead, nhid, nlayers, dropout = 32, 32, 4, 64, 2, 0.1
    S, B = 8, 2

    key = jax.random.PRNGKey(0)
    k_tok, k_par = jax.random.split(key)
    src = jax.random.randint(k_tok, (S, B), 0, ntoken, dtype=jnp.int32)
    params = make_params(k_par, ntoken, ninp, nhead, nhid, nlayers)

    out = transformer_forward(src, params, ninp=ninp, nhead=nhead)
    out = jax.block_until_ready(out)
    assert out.shape == (S, B, ntoken)
    assert bool(jnp.all(jnp.isfinite(out)))
    print("KERNEL_OK")
</pallas_src>

<mosaic_0001>
module attributes {stable_mosaic.version = 11 : i64} {
  func.func @qkv_proj_kernel(%arg0: i32, %arg1: i32, %arg2: memref<1x8x32xf32, #tpu.memory_space<vmem>>, %arg3: memref<32x96xbf16, #tpu.memory_space<vmem>>, %arg4: memref<1x96xf32, #tpu.memory_space<vmem>>, %arg5: memref<1x8x32xbf16, #tpu.memory_space<vmem>>, %arg6: memref<1x8x64xbf16, #tpu.memory_space<vmem>>) attributes {dimension_semantics = [#tpu.dimension_semantics<parallel>, #tpu.dimension_semantics<parallel>], iteration_bounds = array<i64: 2, 1>, scalar_prefetch = 0 : i64, scratch_operands = 0 : i64, tpu.core_type = #tpu.core_type<tc>, window_params = [{transform_indices = @transform_0, window_bounds = array<i64: 1, 8, 32>}, {pipeline_mode = #tpu.pipeline_mode<synchronous>, transform_indices = @transform_1, window_bounds = array<i64: 32, 96>}, {pipeline_mode = #tpu.pipeline_mode<synchronous>, transform_indices = @transform_2, window_bounds = array<i64: 1, 96>}, {transform_indices = @transform_3, window_bounds = array<i64: 1, 8, 32>}, {transform_indices = @transform_4, window_bounds = array<i64: 1, 8, 64>}]} {
    %c0 = arith.constant 0 : index
    %c0_0 = arith.constant 0 : index
    %c0_1 = arith.constant 0 : index
    %0 = vector.load %arg2[%c0, %c0_0, %c0_1] : memref<1x8x32xf32, #tpu.memory_space<vmem>>, vector<1x8x32xf32>
    %1 = vector.shape_cast %0 : vector<1x8x32xf32> to vector<8x32xf32>
    %2 = arith.truncf %1 : vector<8x32xf32> to vector<8x32xbf16>
    %c0_2 = arith.constant 0 : index
    %c0_3 = arith.constant 0 : index
    %3 = vector.load %arg3[%c0_2, %c0_3] : memref<32x96xbf16, #tpu.memory_space<vmem>>, vector<32x96xbf16>
    %cst = arith.constant dense<0.000000e+00> : vector<8x96xf32>
    %4 = tpu.matmul %2, %3, %cst {dimension_numbers = #tpu.dot_dimension_numbers<[1], [0], [0], [1], [0, 0, 1, 1], [], []>} : vector<8x32xbf16>, vector<32x96xbf16>, vector<8x96xf32> -> vector<8x96xf32>
    %c0_4 = arith.constant 0 : index
    %c0_5 = arith.constant 0 : index
    %5 = vector.load %arg4[%c0_4, %c0_5] : memref<1x96xf32, #tpu.memory_space<vmem>>, vector<1x96xf32>
    %6 = vector.broadcast %5 : vector<1x96xf32> to vector<8x96xf32>
    %7 = arith.addf %4, %6 : vector<8x96xf32>
    %8 = vector.extract_strided_slice %7 {offsets = [0, 0], sizes = [8, 32], strides = [1, 1]} : vector<8x96xf32> to vector<8x32xf32>
    %9 = arith.truncf %8 : vector<8x32xf32> to vector<8x32xbf16>
    %c0_6 = arith.constant 0 : index
    %c0_7 = arith.constant 0 : index
    %c0_8 = arith.constant 0 : index
    %10 = vector.load %arg5[%c0_6, %c0_7, %c0_8] : memref<1x8x32xbf16, #tpu.memory_space<vmem>>, vector<1x8x32xbf16>
    %11 = vector.shape_cast %10 : vector<1x8x32xbf16> to vector<8x32xbf16>
    %12 = vector.shape_cast %9 : vector<8x32xbf16> to vector<1x8x32xbf16>
    tpu.vector_store %arg5[%c0_6, %c0_7, %c0_8], %12 {strides = array<i32>} : memref<1x8x32xbf16, #tpu.memory_space<vmem>>, vector<1x8x32xbf16>,
    %13 = vector.extract_strided_slice %7 {offsets = [0, 32], sizes = [8, 64], strides = [1, 1]} : vector<8x96xf32> to vector<8x64xf32>
    %14 = arith.truncf %13 : vector<8x64xf32> to vector<8x64xbf16>
    %c0_9 = arith.constant 0 : index
    %c0_10 = arith.constant 0 : index
    %c0_11 = arith.constant 0 : index
    %15 = vector.load %arg6[%c0_9, %c0_10, %c0_11] : memref<1x8x64xbf16, #tpu.memory_space<vmem>>, vector<1x8x64xbf16>
    %16 = vector.shape_cast %15 : vector<1x8x64xbf16> to vector<8x64xbf16>
    %17 = vector.shape_cast %14 : vector<8x64xbf16> to vector<1x8x64xbf16>
    tpu.vector_store %arg6[%c0_9, %c0_10, %c0_11], %17 {strides = array<i32>} : memref<1x8x64xbf16, #tpu.memory_space<vmem>>, vector<1x8x64xbf16>,
    return
  }
  func.func @transform_0(%arg0: i32, %arg1: i32) -> (i32, i32, i32) {
    %c0_i32 = arith.constant 0 : i32
    %c0_i32_0 = arith.constant 0 : i32
    return %arg0, %arg1, %c0_i32 : i32, i32, i32
  }
  func.func @transform_1(%arg0: i32, %arg1: i32) -> (i32, i32) {
    %c0_i32 = arith.constant 0 : i32
    %c0_i32_0 = arith.constant 0 : i32
    %c0_i32_1 = arith.constant 0 : i32
    return %c0_i32, %c0_i32_0 : i32, i32
  }
  func.func @transform_2(%arg0: i32, %arg1: i32) -> (i32, i32) {
    %c0_i32 = arith.constant 0 : i32
    %c0_i32_0 = arith.constant 0 : i32
    %c0_i32_1 = arith.constant 0 : i32
    return %c0_i32, %c0_i32_0 : i32, i32
  }
  func.func @transform_3(%arg0: i32, %arg1: i32) -> (i32, i32, i32) {
    %c0_i32 = arith.constant 0 : i32
    %c0_i32_0 = arith.constant 0 : i32
    return %arg0, %arg1, %c0_i32 : i32, i32, i32
  }
  func.func @transform_4(%arg0: i32, %arg1: i32) -> (i32, i32, i32) {
    %c0_i32 = arith.constant 0 : i32
    %c0_i32_0 = arith.constant 0 : i32
    return %arg0, %arg1, %c0_i32 : i32, i32, i32
  }
}

</mosaic_0001>

<bundles_post_ra>
// kernel: tpu_custom_call.1
= control target key start
LH: loop header
LB: loop body
LE: loop exit
PB: predicated region body
PF: predicated region fallthrough
CT: control target
= control target key end

     0   :  { %10 = vsyncpa [#allocation3], 0  ;;  %s961_s0 = inlined_call_operand.hbm [shape: f32[2,8,32], index: 0, kind: input, shape index: {}]   ;;  %s962_s1 = inlined_call_operand.hbm [shape: bf16[32,96], index: 1, kind: input, shape index: {}]   ;;  %s963_s2 = inlined_call_operand.vmem [shape: f32[1,96], index: 2, kind: input, shape index: {}]   ;;  %s964_s3 = inlined_call_operand.hbm [shape: bf16[2,8,32], index: 3, kind: output, shape index: {0}]   ;;  %s965_s4 = inlined_call_operand.hbm [shape: bf16[2,8,64], index: 4, kind: output, shape index: {1}]  }
   0x1   :  { %12 = vsyncpa [#allocation3 + $0x1], 0 }
   0x2   :  { %13 = vsyncpa [#allocation6], 0 }
   0x3   :  { %14 = vsyncpa [#allocation4], 0 }
   0x4   :  { %16 = vsyncpa [#allocation4 + $0x1], 0 }
   0x5   :  { %17 = vsyncpa [#allocation9], 0 }
   0x6   :  { %19 = vsyncpa [#allocation9 + $0x1], 0  ;;  %s792_s15 = smov 0   ;;  %s794_s16 = smov 0  }
   0x7   :  { %s796_s17 = smov 0   ;;  %s798_s18 = smov 0  }
   0x8   :  { %s800_s19 = smov 0   ;;  %s802_s20 = smov 0  }
   0x9 LB: > { %s472_s21 = sadd.s32 4294967295, %s761_s20   ;;  %p474_p0 = scmp.ge.s32.totalorder %s761_s20, 1  ;;  %s761_s20 = sphi %s802_s20, %s25_s20   ;;  %s757_s19 = sphi %s800_s19, %s976_s19   ;;  %s753_s18 = sphi %s798_s18, %s975_s18   ;;  %s749_s17 = sphi %s796_s17, %s974_s17   ;;  %s745_s16 = sphi %s794_s16, %s973_s16   ;;  %s741_s15 = sphi %s792_s15, %s972_s15  }
   0xa   : > { %p824_p1 = scmp.eq.s32.totalorder %s472_s21, 0  ;;  %p168_p2 = scmp.lt.s32.totalorder %s761_s20, 3 }
   0xb   : > { %s179_s25 = sshll.u32 %s962_s1, 4  ;;  %s763_s27 = smov [#allocation5]   ;;  %s180_s25 = int_to_ptr.hbm [resolvable:$true] %s179_s25 }
   0xc   : > { %p832_p3 = pnand %p474_p0, %p168_p2  ;;  %s181_s28 = sshll.u32 %s763_s27, 4  ;;  %s182_s28 = int_to_ptr.vmem [resolvable:$true] %s181_s28 }
   0xd   : > { %p476_p6 = scmp.ge.s32.totalorder %s761_s20, 2  ;;  %s764_s29 = smov 64  }
   0xe   : > { %p511_p4 = pneg %p832_p3  ;;  %s765_s30 = smov 4  }
   0xf   : > { %s473_s5 = sadd.s32 4294967294, %s761_s20   ;;  %s37_s6 = sadd.s32 1, %s757_s19 }
  0x10   : > { %p512_p5 = pnand %p511_p4, %p824_p1  ;;  %s46_s7 = sadd.s32 1, %s749_s17 }
  0x11   : > { %p39_p7 = scmp.ge.s32.totalorder %s37_s6, 2  ;;  %p53_p8 = scmp.ne.s32.totalorder %s749_s17, %s745_s16 }
  0x12   : > { %514 = dma.hbm_to_vmem [thread:$0]  (!%p512_p5), %s180_s25, 256, %s182_s28, [#allocation6], %s764_s29, %s764_s29, %s765_s30  }
  0x13   : > { %p54_p9 = scmp.eq.s32.totalorder %s761_s20, 0  ;;  %p59_p10 = scmp.ne.s32.totalorder %s745_s16, %s741_s15 }
  0x14   : > { %s978_s6 = smov (%p39_p7, %s37_s6), 0  ;;  %p127_p13 = scmp.eq.s32.totalorder %s472_s21, 1 }
  0x15   : > { %p851_p11 = por %p54_p9, %p53_p8  ;;  %p857_p12 = por %p824_p1, %p59_p10 }
  0x16   : > { %s41_s10 = ssub.s32 %s757_s19, %s978_s6  ;;  %p133_p2 = scmp.eq.s32.totalorder %s473_s5, 1 }
  0x17   : > { %p44_p0 = scmp.eq.s32.totalorder %s41_s10, 0  ;;  %p863_p4 = por %p127_p13, %p53_p8 }
  0x18   : > { %p527_p5 = scmp.lt.s32.totalorder %s761_s20, 2  ;;  %p871_p7 = por %p133_p2, %p59_p10 }
  0x19   : > { %s869_s12 = scalar_select %p44_p0, %s749_s17, %s46_s7  }
  0x1a   : > { %s198_s14 = sand.u32 1, %s749_s17   ;;  %s478_s24 = sshll.u32 %s757_s19, 3 }
  0x1b   : > { %s477_s23 = sshll.u32 %s198_s14, 3  ;;  %s207_s21 = scalar_lea.hbm %s961_s0, %s478_s24 }
  0x1c   : > { %s202_s28 = scalar_lea.vmem [#allocation2], %s477_s23  ;;  %s209_s30 = sshll.u32 %s207_s21, 4  ;;  %s210_s30 = int_to_ptr.hbm [resolvable:$true] %s209_s30 }
  0x1d   : > { %s211_s29 = sshll.u32 %s202_s28, 4  ;;  %p516_p8 = pnand %p527_p5, %p851_p11  ;;  %s212_s29 = int_to_ptr.vmem [resolvable:$true] %s211_s29 }
  0x1e   : > { %s199_s5 = scalar_lea.sflag [#allocation3], %s198_s14  ;;  %220 = sbr.rel (%p832_p3) target bundleno = 294 (0x126), region = 32 }
  0x1f   : > { %518 = dma.hbm_to_vmem [thread:$0]  (!%p516_p8), %s210_s30, 128, %s212_s29, %s199_s5  }
  0x20   : > { %s885_s7 = sand.u32 (!%p832_p3), 1, %s745_s16  }
  0x21   : > { %s480_s10 = sshll.u32 (!%p832_p3), %s885_s7, 3  ;;  %s223_s24 = scalar_lea.sflag (!%p832_p3), [#allocation3], %s885_s7 }
  0x22   : > { %s226_s23 = scalar_lea.vmem (!%p832_p3), [#allocation2], %s480_s10 }
  0x23   : > { %724 = dma.done.wait (%p857_p12), %s223_s24, 128  }
  0x24   : > { %726 = vsyncadd (%p857_p12), %s223_s24, 4294967168 }
  0x25   : > { %728 = dma.done.wait (%p824_p1), [#allocation6], 256  }
  0x26   : > { %730 = vsyncadd (%p824_p1), [#allocation6], 4294967040  ;;  %v500_v0 = vld [vmem:[#allocation5 + $0x8] sm:$0xff]  ;;  %v499_v1 = vld [vmem:[#allocation5] sm:$0xff]  ;;  %vm285_vm0 = vcmask 261120   ;;  %s495_s26 = sshll.u32 %s753_s18, 2 }
  0x27   : > { %295 = vmatpush.bf16.msra.mxu0 %v500_v0  ;;  %v263_v2 = vld [vmem:[%s226_s23] sm:$0xff]  ;;  %s482_s8 = sshll.u32 %s885_s7, 2  ;;  %s328_s27 = scalar_lea.hbm %s964_s3, %s495_s26  ;;  %vm303_vm1 = vcmask 257024  }
  0x28   : > { %v264_v3 = vpack.c.bf16 %v263_v2, %v263_v2  ;;  %v582_v4 = vld [vmem:[%s963_s2] ss:$0 sm:$0xff]  ;;  %s254_s21 = scalar_lea.vmem [#allocation7], %s482_s8  ;;  %s332_s29 = sshll.u32 %s328_s27, 4  ;;  %s333_s29 = int_to_ptr.hbm [resolvable:$true] %s332_s29 }
  0x29   : > { %s330_s28 = sshll.u32 %s254_s21, 4  ;;  %s766_s30 = smov 96   ;;  %s331_s28 = int_to_ptr.vmem [resolvable:$true] %s330_s28 }
  0x2a   : > { %s312_s5 = scalar_lea.sflag [#allocation4], %s885_s7  ;;  %s657_s10 = sshra.s32 %s333_s29, 4  ;;  %s658_s10 = int_to_ptr.hbm [resolvable:$true] %s657_s10 }
  0x2b   : > { %296 = vmatpush.bf16.msra.mxu0 %v499_v1  ;;  %s659_s24 = scalar_lea.hbm %s658_s10, 4  ;;  %s663_s14 = scalar_lea.hbm %s964_s3, 8 }
  0x2c   : > { %p660_p1 = scmp.ne.s32.totalorder %s658_s10, %s659_s24  ;;  %p664_p10 = scmp.lt.s32.totalorder %s658_s10, %s964_s3 }
  0x2d   : > { %p665_p11 = scmp.lt.s32.totalorder %s663_s14, %s659_s24 }
  0x2e   : > { %492 = vmatmul.msk.bf16.vlgmr.msra.gmra.mxu0 %vm285_vm0, %v264_v3  ;;  %p661_p3 = pnand %p660_p1, %p863_p4 }
  0x2f   : > { %p666_p12 = por %p665_p11, %p664_p10 }
  0x30   : > { %p662_p9 = pneg %p661_p3 }
  0x32   : > { %p667_p13 = pnand %p666_p12, %p662_p9 }
  0xab   : > { %v298_v5 = vpop.f32.mrf.mxu0 }
  0xac   : > { %v299_v6 = vadd.f32 %v582_v4, %v298_v5 }
  0xae   : > { %v302_v7 = vpack.c.bf16 %v299_v6, %v299_v6 }
  0xb0   : > { %306 = vrot.lane.b32.xlu0 %v302_v7, %s766_s30  ;;  %304 = vst.msk [vmem:[%s254_s21] sm:$0xf] %vm303_vm1, %v302_v7 }
  0xb1   : > { %670 = shalt.err (!%p667_p13)
}
  0xb2   : > { %507 = dma.vmem_to_hbm [thread:$0]  (%p863_p4), %s331_s28, 64, %s333_s29, %s312_s5   ;;  %vm309_vm2 = vcmask 519168  }
  0xb3   : > { %v300_v8 = vpop.f32.mrf.mxu0  ;;  %s343_s30 = scalar_lea.hbm %s965_s4, %s495_s26  ;;  %s261_s23 = scalar_lea.vmem [#allocation8], %s482_s8 }
  0xb4   : > { %s345_s10 = sshll.u32 %s261_s23, 4  ;;  %s347_s24 = sshll.u32 %s343_s30, 4  ;;  %s346_s10 = int_to_ptr.vmem [resolvable:$true] %s345_s10  ;;  %s348_s24 = int_to_ptr.hbm [resolvable:$true] %s347_s24 }
  0xb5   : > { %s317_s9 = scalar_lea.sflag [#allocation9], %s885_s7  ;;  %s685_s14 = sshra.s32 %s348_s24, 4  ;;  %s686_s14 = int_to_ptr.hbm [resolvable:$true] %s685_s14 }
  0xb6   : > { %s687_s28 = scalar_lea.hbm %s686_s14, 4  ;;  %s691_s26 = scalar_lea.hbm %s965_s4, 8 }
  0xb7   : > { %p688_p0 = scmp.ne.s32.totalorder %s686_s14, %s687_s28  ;;  %p692_p8 = scmp.lt.s32.totalorder %s686_s14, %s965_s4 }
  0xb8   : > { %p693_p1 = scmp.lt.s32.totalorder %s691_s26, %s687_s28 }
  0xb9   : > { %p689_p2 = pnand %p688_p0, %p863_p4 }
  0xba   : > { %p694_p3 = por %p693_p1, %p692_p8 }
  0xbb   : > { %p690_p5 = pneg %p689_p2 }
  0xbd   : > { %p695_p9 = pnand %p694_p3, %p690_p5 }
 0x122   : > { %v307_v9 = vpop.permute.xlu0 %306 }
 0x123   : > { %310 = vst.msk [vmem:[%s261_s23] sm:$0xf] %vm309_vm2, %v307_v9 }
 0x124   : > { %698 = shalt.err (!%p695_p9)
}
 0x125   : > { %508 = dma.vmem_to_hbm [thread:$0]  (%p863_p4), %s346_s10, 64, %s348_s24, %s317_s9  }
 0x126 PF: > { %s359_s7 = sand.u32 1, %s741_s15   ;;  %p520_p10 = pnand %p476_p6, %p871_p7 }
 0x127   : > { %s360_s22 = scalar_lea.sflag [#allocation4], %s359_s7 }
 0x128   : > { %p521_p11 = pneg %p520_p10 }
 0x12a   : > { %732 = dma.done.wait (%p521_p11), %s360_s22, 64  }
 0x12b   : > { %734 = vsyncadd (%p521_p11), %s360_s22, 4294967232  ;;  %s370_s25 = scalar_lea.sflag [#allocation9], %s359_s7 }
 0x12c   : > { %736 = dma.done.wait (%p521_p11), %s370_s25, 64  }
 0x12d   : > { %738 = vsyncadd (%p521_p11), %s370_s25, 4294967232  ;;  %s25_s20 = sadd.s32 1, %s761_s20   ;;  %s972_s15 = smov %s745_s16 }
 0x12e   : > { %p22_p12 = scmp.ge.s32.totalorder %s25_s20, 4   ;;  %s973_s16 = smov %s749_s17 }
 0x12f   : > { %s974_s17 = smov %s869_s12  ;;  %s975_s18 = smov %s757_s19 }
 0x130   : > { %s976_s19 = smov %s978_s6  ;;  %24 = sbr.rel (!%p22_p12) target bundleno = 9 (0x9), region = 98 }
 0x135   :  { %376 = vsyncpa [#allocation3], 1 }
 0x136   :  { %378 = vsyncpa [#allocation3 + $0x1], 1 }
 0x137   :  { %379 = vsyncpa [#allocation6], 1 }
 0x138   :  { %380 = vsyncpa [#allocation4], 1 }
 0x139   :  { %382 = vsyncpa [#allocation4 + $0x1], 1 }
 0x13a   :  { %383 = vsyncpa [#allocation9], 1 }
 0x13b   :  { %385 = vsyncpa [#allocation9 + $0x1], 1 }

</bundles_post_ra>
